<compile_context>
chip_gen: v5e
topology: v5e:2x2
jax: 0.10.0
libtpu: 0.0.40
codegen_flags: <defaults>
</compile_context>

<pallas_src>
import jax
import jax.numpy as jnp
import numpy as np
from jax.experimental import pallas as pl
from jax.experimental.pallas import tpu as pltpu


def _round_up(v, m):
    return ((v + m - 1) // m) * m


def _round_down(v, m):
    return (v // m) * m


# ----------------------------------------------------------------------------
# Kernel 1: W = (I + A + A^2 + ... + A^order) @ (I + A), computed once on-device.
# ----------------------------------------------------------------------------
def _make_w_kernel(order: int):
    def kernel(a_ref, w_ref):
        A = a_ref[...].astype(jnp.float32)
        dim = A.shape[-1]
        I = jnp.eye(dim, dtype=jnp.float32)
        inv_approx = I
        A_power = A
        # `order` is a Python constant -> fully unrolled MXU matmul chain, kept in f32.
        for step in range(order):
            inv_approx = inv_approx + A_power
            if step + 1 < order:  # skip the final, unused A^(order+1)
                A_power = jnp.dot(A_power, A, preferred_element_type=jnp.float32)
        # W = inv_approx @ (I + A) == inv_approx + inv_approx @ A  (fold the identity).
        W = inv_approx + jnp.dot(inv_approx, A, preferred_element_type=jnp.float32)
        w_ref[...] = W.astype(w_ref.dtype)

    return kernel


# ----------------------------------------------------------------------------
# Kernel 2: hot path  out = x @ W + bias   (2-D grid: row tiles x W-column tiles).
# ----------------------------------------------------------------------------
def _xw_bias_kernel(x_ref, w_ref, b_ref, o_ref):
    acc = jnp.dot(x_ref[...], w_ref[...], preferred_element_type=jnp.float32)
    o_ref[...] = (acc + b_ref[...]).astype(o_ref.dtype)  # bias add in f32, single final cast


def cayley_linear_approx(x, angles, bias=None, *, order=1, block_rows=None):
    """Pallas implementation of CayleyLinearApprox.forward.

    x: (n, dim), angles: (dim*(dim-1)//2,), bias: (dim,) or None.
    """
    n, dim = x.shape
    itemsize = int(jnp.dtype(x.dtype).itemsize)

    # --- glue: skew-symmetric A from the angle vector (row-major upper-triangle order) ---
    iu = jnp.triu_indices(dim, k=1)
    A = jnp.zeros((dim, dim), dtype=jnp.float32).at[iu].set(angles.astype(jnp.float32))
    A = A - A.T

    # --- 1) Cayley polynomial, computed once, emitted directly in x.dtype (no XLA passes) ---
    W = pl.pallas_call(
        _make_w_kernel(order),
        out_shape=jax.ShapeDtypeStruct((dim, dim), x.dtype),
    )(A)

    if bias is None:
        b = jnp.zeros((1, dim), dtype=jnp.float32)
    else:
        b = bias.astype(jnp.float32).reshape(1, dim)

    # --- 2) per-generation VMEM budget (v5e/v6e: 128 MiB, v7x: 64 MiB) ---
    try:
        vmem_cap = int(getattr(pltpu.get_tpu_info(), "vmem_capacity_bytes",
                               64 * 1024 * 1024))
    except Exception:  # pragma: no cover - conservative fallback (v7x-sized)
        vmem_cap = 64 * 1024 * 1024
    vmem_budget = min(int(vmem_cap * 0.85), 112 * 1024 * 1024)
    headroom = 2 * 1024 * 1024

    # --- 3) W column tile: only tile when the (double-buffer-accounted) W would crowd VMEM ---
    if dim <= 256 or 2 * dim * dim * itemsize <= (2 * vmem_budget) // 3:
        tn = dim                                   # single column tile, W fully resident
    else:
        tn = _round_down((vmem_budget // 3) // max(dim * itemsize, 1), 128)
        tn = max(128, min(tn, _round_up(dim, 128)))
        if tn >= dim:
            tn = dim
    n_col_tiles = pl.cdiv(dim, tn)

    # --- 4) row tile sized against the VMEM budget (conservative: W/bias counted double-buffered) ---
    fixed = 2 * dim * tn * itemsize + 2 * tn * 4
    per_row = 2 * dim * itemsize + 2 * tn * itemsize + tn * 4  # x + out (x2 bufs) + f32 accumulator
    avail = vmem_budget - headroom - fixed
    rows_by_vmem = max(8, avail // per_row) if avail > 0 else 8

    if block_rows is None:
        block_rows = 4096 if dim <= 512 else (1024 if dim <= 2048 else 256)

    br = min(block_rows, rows_by_vmem, _round_up(n, 8))
    if n >= 512 and pl.cdiv(n, max(br, 1)) * n_col_tiles < 2:
        br = _round_up(pl.cdiv(n, 2), 8)           # >=2 grid steps so both v7x TCs get work
    br = max(8, _round_down(br, 8))

    need = fixed + per_row * br + headroom
    vmem_limit = int(min(max(need, 32 * 1024 * 1024), int(vmem_cap * 0.9)))

    # --- 5) constant-index W / bias blocks; single-buffer hint when the block is large ---
    w_index = lambda i, j: (0, j)
    b_index = lambda i, j: (0, j)
    w_spec = b_spec = None
    if dim * tn * itemsize > (2 << 20):
        try:
            w_spec = pl.BlockSpec((dim, tn), w_index, pipeline_mode=pl.Buffered(1))
            b_spec = pl.BlockSpec((1, tn), b_index, pipeline_mode=pl.Buffered(1))
        except (TypeError, AttributeError):
            w_spec = b_spec = None
    if w_spec is None:
        w_spec = pl.BlockSpec((dim, tn), w_index)
        b_spec = pl.BlockSpec((1, tn), b_index)

    out = pl.pallas_call(
        _xw_bias_kernel,
        out_shape=jax.ShapeDtypeStruct((n, dim), x.dtype),
        grid=(pl.cdiv(n, br), n_col_tiles),
        in_specs=[
            pl.BlockSpec((br, dim), lambda i, j: (i, 0)),   # x row tile (unpadded feature dim)
            w_spec,                                          # W: constant over rows, tiled over cols
            b_spec,                                          # bias (f32)
        ],
        out_specs=pl.BlockSpec((br, tn), lambda i, j: (i, j)),
        compiler_params=pltpu.CompilerParams(
            dimension_semantics=("parallel", "parallel"),
            vmem_limit_bytes=vmem_limit,
        ),
    )(x, W, b)
    return out


def _reference(x, angles, bias, order=1):
    n, dim = x.shape
    iu = jnp.triu_indices(dim, k=1)
    A = jnp.zeros((dim, dim), dtype=x.dtype).at[iu].set(angles.astype(x.dtype))
    A = A - A.T
    I = jnp.eye(dim, dtype=x.dtype)
    I_plus_A = I + A
    inv_approx = I
    A_power = A
    for _ in range(order):
        inv_approx = inv_approx + A_power
        A_power = A_power @ A
    W = inv_approx @ I_plus_A
    out = x @ W
    if bias is not None:
        out = out + bias
    return out


if __name__ == "__main__":
    dim = 32       # hidden size
    seq = 8        # number of rows in x
    order = 1

    key = jax.random.PRNGKey(0)
    k_ang, k_x = jax.random.split(key)
    num_params = dim * (dim - 1) // 2
    angles = jax.random.normal(k_ang, (num_params,), dtype=jnp.float32) * 0.01
    bias = jnp.zeros((dim,), dtype=jnp.float32)
    x = jax.random.normal(k_x, (seq, dim), dtype=jnp.float32)

    out = jax.block_until_ready(cayley_linear_approx(x, angles, bias, order=order))
    ref = _reference(x, angles, bias, order=order)
    np.testing.assert_allclose(np.asarray(out), np.asarray(ref), rtol=1e-5, atol=1e-5)

    # bias=None branch
    out_nb = jax.block_until_ready(cayley_linear_approx(x, angles, None, order=order))
    ref_nb = _reference(x, angles, None, order=order)
    np.testing.assert_allclose(np.asarray(out_nb), np.asarray(ref_nb), rtol=1e-5, atol=1e-5)

    # Extra coverage: multi-step row grid, partial last row tile, order > 1, nonzero bias.
    n2 = 200
    x2 = jax.random.normal(jax.random.PRNGKey(1), (n2, dim), dtype=jnp.float32)
    bias2 = jax.random.normal(jax.random.PRNGKey(2), (dim,), dtype=jnp.float32) * 0.1
    out2 = jax.block_until_ready(
        cayley_linear_approx(x2, angles, bias2, order=2, block_rows=64))
    ref2 = _reference(x2, angles, bias2, order=2)
    np.testing.assert_allclose(np.asarray(out2), np.asarray(ref2), rtol=1e-5, atol=1e-5)

    print("KERNEL_OK")
</pallas_src>

<mosaic_0001>
module attributes {stable_mosaic.version = 11 : i64} {
  func.func @kernel(%arg0: memref<32x32xf32, #tpu.memory_space<vmem>>, %arg1: memref<32x32xf32, #tpu.memory_space<vmem>>) attributes {dimension_semantics = [], scalar_prefetch = 0 : i64, scratch_operands = 0 : i64, tpu.core_type = #tpu.core_type<tc>} {
    %c0 = arith.constant 0 : index
    %c0_0 = arith.constant 0 : index
    %0 = vector.load %arg0[%c0, %c0_0] : memref<32x32xf32, #tpu.memory_space<vmem>>, vector<32x32xf32>
    %1 = tpu.iota {dimensions = array<i32: 0>} : vector<32x32xi32>
    %2 = tpu.iota {dimensions = array<i32: 1>} : vector<32x32xi32>
    %c0_i32 = arith.constant 0 : i32
    %3 = vector.broadcast %c0_i32 : i32 to vector<32x32xi32>
    %4 = arith.addi %1, %3 : vector<32x32xi32>
    %5 = arith.cmpi eq, %4, %2 : vector<32x32xi32>
    %6 = arith.extui %5 : vector<32x32xi1> to vector<32x32xi32>
    %7 = arith.sitofp %6 : vector<32x32xi32> to vector<32x32xf32>
    %8 = arith.addf %7, %0 : vector<32x32xf32>
    %cst = arith.constant dense<0.000000e+00> : vector<32x32xf32>
    %9 = tpu.matmul %8, %0, %cst {dimension_numbers = #tpu.dot_dimension_numbers<[1], [0], [0], [1], [0, 0, 1, 1], [], []>} : vector<32x32xf32>, vector<32x32xf32>, vector<32x32xf32> -> vector<32x32xf32>
    %10 = arith.addf %8, %9 : vector<32x32xf32>
    %c0_1 = arith.constant 0 : index
    %c0_2 = arith.constant 0 : index
    %11 = vector.load %arg1[%c0_1, %c0_2] : memref<32x32xf32, #tpu.memory_space<vmem>>, vector<32x32xf32>
    tpu.vector_store %arg1[%c0_1, %c0_2], %10 {strides = array<i32>} : memref<32x32xf32, #tpu.memory_space<vmem>>, vector<32x32xf32>,
    return
  }
}

</mosaic_0001>

<bundles_post_ra>
// kernel: tpu_custom_call.1
= control target key start
LH: loop header
LB: loop body
LE: loop exit
PB: predicated region body
PF: predicated region fallthrough
CT: control target
= control target key end

     0   :  { %6 = vsyncpa [#allocation3], 0  ;;  %s233_s0 = inlined_call_operand.hbm [shape: f32[32,32], index: 0, kind: input, shape index: {}]   ;;  %s234_s1 = inlined_call_operand.hbm [shape: f32[32,32], index: 1, kind: output, shape index: {}]  }
   0x1   :  { %7 = vsyncpa [#allocation4], 0  ;;  %s12_s8 = sshll.u32 %s233_s0, 4  ;;  %s198_s9 = smov [#allocation2]   ;;  %s13_s8 = int_to_ptr.hbm [resolvable:$true] %s12_s8 }
   0x2   :  { %s14_s10 = sshll.u32 %s198_s9, 4  ;;  %s199_s11 = smov 128   ;;  %s15_s10 = int_to_ptr.vmem [resolvable:$true] %s14_s10 }
   0x3   :  { %s200_s12 = smov 8  }
   0x4   :  { %20 = dma.hbm_to_vmem [thread:$0]  %s13_s8, 512, %s15_s10, [#allocation3], %s199_s11, %s199_s11, %s200_s12  }
   0x5   :  { %194 = dma.done.wait [#allocation3], 512  }
   0x6   :  { %195 = vsyncadd [#allocation3], 4294966784  ;;  %v29_v0 = vlaneseq  ;;  %v28_v6 = vld [vmem:[#allocation2 + $0x18] sm:$0xff]  ;;  %v27_v7 = vld [vmem:[#allocation2 + $0x10] sm:$0xff]  ;;  %v201_v8 = vmov 0.0   ;;  %vm52_vm4 = vcmask 261120  }
   0x7   :  { %130 = vmatpush.msra.mxu2 %v28_v6  ;;  %131 = vmatpush.msra.mxu3 %v28_v6  ;;  %v26_v11 = vld [vmem:[#allocation2 + $0x8] sm:$0xff]  ;;  %v25_v14 = vld [vmem:[#allocation2] sm:$0xff]  ;;  %s202_s0 = smov [#allocation5]   ;;  %s108_s16 = sshll.u32 %s234_s1, 4  ;;  %s109_s16 = int_to_ptr.hbm [resolvable:$true] %s108_s16 }
   0x8   :  { %v30_v1 = vshrl.u32 %v29_v0, 7  ;;  %v35_v2 = vand.u32 127, %v29_v0  ;;  %77 = vmatpush.msra.mxu0 %v28_v6  ;;  %129 = vmatpush.msra.mxu1 %v28_v6  ;;  %s106_s13 = sshll.u32 %s202_s0, 4  ;;  %s107_s13 = int_to_ptr.vmem [resolvable:$true] %s106_s13 }
   0x9   :  { %133 = vmatpush.msra.mxu2 %v27_v7  ;;  %134 = vmatpush.msra.mxu3 %v27_v7 }
   0xa   :  { %v32_v3 = vadd.s32 16, %v30_v1  ;;  %v33_v4 = vadd.s32 24, %v30_v1  ;;  %v31_v5 = vadd.s32 8, %v30_v1  ;;  %vm36_vm2 = vcmp.eq.s32.totalorder %v30_v1, %v35_v2  ;;  %78 = vmatpush.msra.mxu0 %v27_v7  ;;  %132 = vmatpush.msra.mxu1 %v27_v7 }
   0xb   :  { %v121_v12 = vsel %vm36_vm2, 1.0, %v201_v8  ;;  %136 = vmatpush.msra.mxu2 %v26_v11  ;;  %137 = vmatpush.msra.mxu3 %v26_v11 }
   0xc   :  { %vm38_vm0 = vcmp.eq.s32.totalorder %v32_v3, %v35_v2  ;;  %vm39_vm1 = vcmp.eq.s32.totalorder %v33_v4, %v35_v2  ;;  %vm37_vm3 = vcmp.eq.s32.totalorder %v31_v5, %v35_v2  ;;  %79 = vmatpush.msra.mxu0 %v26_v11  ;;  %135 = vmatpush.msra.mxu1 %v26_v11 }
   0xd   :  { %v123_v9 = vsel %vm38_vm0, 1.0, %v201_v8  ;;  %v124_v10 = vsel %vm39_vm1, 1.0, %v201_v8  ;;  %v122_v13 = vsel %vm37_vm3, 1.0, %v201_v8  ;;  %v48_v17 = vadd.f32 %v121_v12, %v25_v14  ;;  %139 = vmatpush.msra.mxu2 %v25_v14  ;;  %140 = vmatpush.msra.mxu3 %v25_v14 }
   0xe   :  { %v50_v15 = vadd.f32 %v123_v9, %v27_v7  ;;  %v51_v16 = vadd.f32 %v124_v10, %v28_v6  ;;  %v49_v18 = vadd.f32 %v122_v13, %v26_v11  ;;  %80 = vmatpush.msra.mxu0 %v25_v14  ;;  %138 = vmatpush.msra.mxu1 %v25_v14 }
   0xf   :  { %125 = vmatmul.msk.f32.vlgmr.msra.gmra.mxu0 %vm52_vm4, %v48_v17 }
  0x10   :  { %127 = vmatmul.msk.f32.vlgmr.msra.gmra.mxu2 %vm52_vm4, %v50_v15  ;;  %128 = vmatmul.msk.f32.vlgmr.msra.gmra.mxu3 %vm52_vm4, %v51_v16 }
  0x11   :  { %126 = vmatmul.msk.f32.vlgmr.msra.gmra.mxu1 %vm52_vm4, %v49_v18 }
  0x8c   :  { %v82_v19 = vpop.f32.mrf.mxu0 }
  0x8d   :  { %v94_v21 = vadd.f32 %v82_v19, %v48_v17 }
  0x8e   :  { %v85_v20 = vpop.f32.mrf.mxu1 }
  0x8f   :  { %v95_v22 = vadd.f32 %v85_v20, %v49_v18  ;;  %98 = vst.msk [vmem:[#allocation5] sm:$0xff] %vm52_vm4, %v94_v21 }
  0x91   :  { %99 = vst.msk [vmem:[#allocation5 + $0x8] sm:$0xff] %vm52_vm4, %v95_v22 }
  0x93   :  { %v88_v23 = vpop.f32.mrf.mxu2  ;;  %v91_v24 = vpop.f32.mrf.mxu3 }
  0x94   :  { %v96_v25 = vadd.f32 %v88_v23, %v50_v15  ;;  %v97_v26 = vadd.f32 %v91_v24, %v51_v16 }
  0x96   :  { %100 = vst.msk [vmem:[#allocation5 + $0x10] sm:$0xff] %vm52_vm4, %v96_v25 }
  0x97   :  { %101 = vst.msk [vmem:[#allocation5 + $0x18] sm:$0xff] %vm52_vm4, %v97_v26 }
  0x98   :  { %114 = dma.vmem_to_hbm [thread:$0]  %s107_s13, 512, %s109_s16, [#allocation4], %s199_s11, %s199_s11, %s200_s12  }
  0x99   :  { %196 = dma.done.wait [#allocation4], 512  }
  0x9a   :  { %197 = vsyncadd [#allocation4], 4294966784 }
  0x9b   :  { %119 = vsyncpa [#allocation3], 1 }
  0x9c   :  { %120 = vsyncpa [#allocation4], 1 }

</bundles_post_ra>
